<compile_context>
chip_gen: v5e
topology: v5e:2x2
jax: 0.10.0
libtpu: 0.0.40
codegen_flags: <defaults>
</compile_context>

<pallas_src>
import jax
import jax.numpy as jnp
from jax.experimental import pallas as pl
from jax.experimental.pallas import tpu as pltpu


TILE_BYTES = 2 * 1024 * 1024          # ~2 MiB per tile; 4 pipelined buffers = 8 MiB VMEM
_LANE_CANDIDATES = (1024, 512, 256, 128)


def _identity_kernel(x_ref, o_ref):
    o_ref[...] = x_ref[...]


def pallas_identity(x):
    """y = x, streamed through a tiled Pallas copy kernel (shape/dtype preserved)."""
    orig_shape, dtype = x.shape, x.dtype
    n = x.size
    if n == 0:
        return x

    itemsize = jnp.dtype(dtype).itemsize
    # sublane packing multiple: 8 for 32-bit, 16 for 16-bit, 32 for 8-bit dtypes
    sub_mult = max(8, 32 // itemsize)

    flat = x.reshape(-1)  # free row-major reshape, no data movement

    # Widest lane-dense width (multiple of 128) that divides n exactly.
    lane_w = next((w for w in _LANE_CANDIDATES if n % w == 0), None)

    if lane_w is not None:
        rows = n // lane_w
        # Keep tile ~TILE_BYTES regardless of dtype; tm a multiple of sub_mult.
        tm_max = max(sub_mult,
                     (TILE_BYTES // (lane_w * itemsize)) // sub_mult * sub_mult)
        if rows <= tm_max:
            tm = rows          # full-extent block: always layout-legal, grid == 1
        else:
            tm = tm_max        # multiple of sub_mult; last block masked by Pallas
        grid = (pl.cdiv(rows, tm),)
        x2 = flat.reshape(rows, lane_w)
        block = (tm, lane_w)
        index_map = lambda i: (i, 0)
        out_rows, out_cols = rows, lane_w
    else:
        # Ragged size (n % 128 != 0): single full-array block, no padding.
        # TODO(synk): very large ragged inputs would need a bulk+tail split;
        # fine for Identity at these sizes.
        grid = (1,)
        x2 = flat.reshape(1, n)
        block = (1, n)
        index_map = lambda i: (0, 0)
        out_rows, out_cols = 1, n

    out = pl.pallas_call(
        _identity_kernel,
        out_shape=jax.ShapeDtypeStruct((out_rows, out_cols), dtype),
        grid=grid,
        in_specs=[pl.BlockSpec(block, index_map)],
        out_specs=pl.BlockSpec(block, index_map),
        compiler_params=pltpu.CompilerParams(
            dimension_semantics=("parallel",),
            vmem_limit_bytes=32 * 1024 * 1024,
        ),
        cost_estimate=pl.CostEstimate(
            flops=0,
            transcendentals=0,
            bytes_accessed=2 * n * itemsize,   # honest: no padding anywhere
        ),
    )(x2)

    return out.reshape(orig_shape)


if __name__ == "__main__":
    key = jax.random.PRNGKey(0)
    k1, k2 = jax.random.split(key)

    # Small example input consistent with the module: batch=2, channels=4, 16x16.
    x = jax.random.normal(k1, (2, 4, 16, 16), jnp.float32)

    fwd = jax.jit(pallas_identity)
    y = fwd(x)
    jax.block_until_ready(y)

    assert y.shape == x.shape and y.dtype == x.dtype
    assert bool(jnp.array_equal(y, x)), "identity kernel changed values"

    # Extra check: ragged size + packed dtype exercises the fallback path.
    x2 = jax.random.normal(k2, (3, 5, 33), jnp.float32).astype(jnp.bfloat16)
    y2 = jax.jit(pallas_identity)(x2)
    jax.block_until_ready(y2)
    assert y2.shape == x2.shape and y2.dtype == x2.dtype
    assert bool(jnp.array_equal(y2, x2)), "identity kernel changed values (bf16)"

    # Larger divisible input exercises the multi-step pipelined path.
    x3 = jax.random.normal(key, (1024, 1024), jnp.float32)
    y3 = jax.jit(pallas_identity)(x3)
    jax.block_until_ready(y3)
    assert bool(jnp.array_equal(y3, x3)), "identity kernel changed values (large)"

    print("KERNEL_OK")
</pallas_src>

<mosaic_0001>
module attributes {stable_mosaic.version = 11 : i64} {
  func.func @_identity_kernel(%arg0: i32, %arg1: memref<2x1024xf32, #tpu.memory_space<vmem>>, %arg2: memref<2x1024xf32, #tpu.memory_space<vmem>>) attributes {dimension_semantics = [#tpu.dimension_semantics<parallel>], iteration_bounds = array<i64: 1>, scalar_prefetch = 0 : i64, scratch_operands = 0 : i64, tpu.core_type = #tpu.core_type<tc>, window_params = [{transform_indices = @transform_0, window_bounds = array<i64: 2, 1024>}, {transform_indices = @transform_1, window_bounds = array<i64: 2, 1024>}]} {
    %c0 = arith.constant 0 : index
    %c0_0 = arith.constant 0 : index
    %0 = vector.load %arg1[%c0, %c0_0] : memref<2x1024xf32, #tpu.memory_space<vmem>>, vector<2x1024xf32>
    %c0_1 = arith.constant 0 : index
    %c0_2 = arith.constant 0 : index
    %1 = vector.load %arg2[%c0_1, %c0_2] : memref<2x1024xf32, #tpu.memory_space<vmem>>, vector<2x1024xf32>
    tpu.vector_store %arg2[%c0_1, %c0_2], %0 {strides = array<i32>} : memref<2x1024xf32, #tpu.memory_space<vmem>>, vector<2x1024xf32>,
    return
  }
  func.func @transform_0(%arg0: i32) -> (i32, i32) {
    %c0_i32 = arith.constant 0 : i32
    %c0_i32_0 = arith.constant 0 : i32
    return %arg0, %c0_i32 : i32, i32
  }
  func.func @transform_1(%arg0: i32) -> (i32, i32) {
    %c0_i32 = arith.constant 0 : i32
    %c0_i32_0 = arith.constant 0 : i32
    return %arg0, %c0_i32 : i32, i32
  }
}

</mosaic_0001>

<bundles_post_ra>
// kernel: pallas_identity.1
= control target key start
LH: loop header
LB: loop body
LE: loop exit
PB: predicated region body
PF: predicated region fallthrough
CT: control target
= control target key end

     0   :  { %s38_s0 = inlined_call_operand.vmem [shape: f32[2,1024], index: 0, kind: input, shape index: {}]   ;;  %s39_s1 = inlined_call_operand.vmem [shape: f32[2,1024], index: 1, kind: output, shape index: {}]  }
   0x1   :  { %v8_v0 = vld [vmem:[%s38_s0] sm:$0xff]  ;;  %v9_v1 = vld [vmem:[%s38_s0 + $0x8] sm:$0xff] }
   0x2   :  { %10 = vst [vmem:[%s39_s1] sm:$0xff] %v8_v0 }
   0x3   :  { %11 = vst [vmem:[%s39_s1 + $0x8] sm:$0xff] %v9_v1 }

</bundles_post_ra>
